<compile_context>
chip_gen: v7x
topology: tpu7x:2x2x1
jax: 0.10.0
libtpu: 0.0.40
codegen_flags: <defaults>
</compile_context>

<pallas_src>
import jax
import jax.numpy as jnp
from jax.experimental import pallas as pl
from jax.experimental.pallas import tpu as pltpu

_BN_EPS = 1e-5


# ---------------------------------------------------------------------------
# Pallas kernel: one output 2x2 row/col-parity block x one Cout tile
# ---------------------------------------------------------------------------

def _up_conv_kernel(x0_ref, x1_ref, x2_ref, w_ref, ss_ref, o_ref):
    """Fused (nearest-up x2) + 3x3 conv + bias/BN + ReLU for two output rows.

    x{0,1,2}_ref : (W+2, Cin) bf16   zero-padded source rows a, a+1, a+2
    w_ref        : (16, Cin, tn) bf16  combined (p, q, i, j) taps,
                                       index = (2p+i)*4 + (2q+j)
    ss_ref       : (2, tn) f32       row 0 = BN scale, row 1 = bias/BN shift
    o_ref        : (2, 2, W, tn) f32 output [row parity, col parity, b, cout]
    """
    out_w = o_ref.shape[2]          # W  (original width)
    tn = o_ref.shape[3]

    rows = (x0_ref[...], x1_ref[...], x2_ref[...])
    # 9 distinct shifted views of the padded source rows (static sublane slices).
    sl = [[rows[k][c:c + out_w, :] for c in range(3)] for k in range(3)]

    scale = ss_ref[0:1, :]
    shift = ss_ref[1:2, :]

    for p in range(2):                           # output row parity
        for q in range(2):                       # output column parity
            acc = jnp.zeros((out_w, tn), jnp.float32)
            for i in range(2):                   # source-row tap
                for j in range(2):               # source-column tap
                    acc += jnp.dot(
                        sl[p + i][q + j],
                        w_ref[(2 * p + i) * 4 + (2 * q + j)],
                        preferred_element_type=jnp.float32,
                    )
            y = acc * scale + shift
            o_ref[p, q] = jnp.maximum(y, 0.0).astype(o_ref.dtype)


# ---------------------------------------------------------------------------
# pallas_call wrapper
# ---------------------------------------------------------------------------

def _pick_cout_tile(cout):
    if cout <= 256:
        return cout                 # full Cout: lane-dense, no tail blocks
    for t in (256, 128):
        if cout % t == 0:
            return t
    return cout                     # full Cout is always a valid block


def _up_conv_pallas(xp, w16, ss, cout):
    """xp: (N, H+2, W+2, Cin) bf16 -> (N, 2H, 2, W, Cout) f32 (col parity split)."""
    n, hp, wp, cin = xp.shape
    h = hp - 2
    w = wp - 2
    tn = _pick_cout_tile(cout)
    grid = (n, cout // tn, h)       # innermost = source row position a

    def _row_spec(k):
        return pl.BlockSpec((None, None, wp, cin),
                            lambda b, j, a, _k=k: (b, a + _k, 0, 0))

    return pl.pallas_call(
        _up_conv_kernel,
        out_shape=jax.ShapeDtypeStruct((n, 2 * h, 2, w, cout), jnp.float32),
        grid=grid,
        in_specs=[
            _row_spec(0),
            _row_spec(1),
            _row_spec(2),
            pl.BlockSpec((16, cin, tn), lambda b, j, a: (0, 0, j)),
            pl.BlockSpec((2, tn), lambda b, j, a: (0, j)),
        ],
        out_specs=pl.BlockSpec((None, 2, 2, w, tn),
                               lambda b, j, a: (b, a, 0, 0, j)),
        compiler_params=pltpu.CompilerParams(
            dimension_semantics=("parallel", "parallel", "arbitrary")),
    )(xp, xp, xp, w16, ss)


# ---------------------------------------------------------------------------
# Module: parameters + forward
# ---------------------------------------------------------------------------

def init_up_conv_params(key, in_ch, out_ch):
    kw, kb = jax.random.split(key)
    fan_in = in_ch * 9
    bound = 1.0 / (fan_in ** 0.5)
    w = jax.random.uniform(kw, (3, 3, in_ch, out_ch), jnp.float32, -bound, bound)
    b = jax.random.uniform(kb, (out_ch,), jnp.float32, -bound, bound)
    bn = (jnp.ones((out_ch,), jnp.float32),   # gamma
          jnp.zeros((out_ch,), jnp.float32),  # beta
          jnp.zeros((out_ch,), jnp.float32),  # running_mean
          jnp.ones((out_ch,), jnp.float32))   # running_var
    return {"conv": (w, b), "bn": bn}


@jax.jit
def up_conv_forward(params, x_nchw):
    w, b = params["conv"]                        # w: (3,3,Cin,Cout), b: (Cout,)
    gamma, beta, mean, var = params["bn"]
    n, cin, h, width = x_nchw.shape
    cout = w.shape[-1]

    # NCHW -> NHWC (cast to bf16 before the transpose to halve its traffic),
    # then zero pad by 1.  Both upsamples are folded into the kernel weights.
    x = jnp.transpose(x_nchw.astype(jnp.bfloat16), (0, 2, 3, 1))
    xp = jnp.pad(x, ((0, 0), (1, 1), (1, 1), (0, 0)))

    # Combined taps: row-combined (index 2p+i), then column-combined (index 2q+j).
    wr = jnp.stack([w[0], w[1] + w[2], w[0] + w[1], w[2]], axis=0)   # (4,3,Cin,Cout)
    wc = jnp.stack([wr[:, 0], wr[:, 1] + wr[:, 2],
                    wr[:, 0] + wr[:, 1], wr[:, 2]], axis=1)          # (4,4,Cin,Cout)
    w16 = wc.reshape(16, cin, cout).astype(jnp.bfloat16)

    # Fold conv bias + eval-mode BatchNorm into a per-channel scale / shift.
    inv = gamma * jax.lax.rsqrt(var + _BN_EPS)
    ss = jnp.stack([inv, beta + (b - mean) * inv], axis=0).astype(jnp.float32)

    y5 = _up_conv_pallas(xp, w16, ss, cout)      # (N, 2H, 2, W, Cout)

    # Column interleave + NHWC->NCHW absorbed into ONE epilogue transpose:
    #   final[n, c, r, 2b+q] = y5[n, r, q, b, c]
    y = jnp.transpose(y5, (0, 4, 1, 3, 2)).reshape(n, cout, 2 * h, 2 * width)
    return y


# ---------------------------------------------------------------------------
# Pure-XLA reference (for a tolerance check; bf16 operands -> loose tolerance)
# ---------------------------------------------------------------------------

def up_conv_reference(params, x_nchw):
    w, b = params["conv"]
    gamma, beta, mean, var = params["bn"]
    x = jnp.transpose(x_nchw, (0, 2, 3, 1)).astype(jnp.float32)
    xu = jnp.repeat(jnp.repeat(x, 2, axis=1), 2, axis=2)
    y = jax.lax.conv_general_dilated(
        xu, w, window_strides=(1, 1), padding=((1, 1), (1, 1)),
        dimension_numbers=("NHWC", "HWIO", "NHWC")) + b
    y = (y - mean) * (gamma / jnp.sqrt(var + _BN_EPS)) + beta
    y = jnp.maximum(y, 0.0)
    return jnp.transpose(y, (0, 3, 1, 2))


# ---------------------------------------------------------------------------
# Main
# ---------------------------------------------------------------------------

if __name__ == "__main__":
    key = jax.random.PRNGKey(0)
    kp, kx = jax.random.split(key)

    in_ch, out_ch = 64, 32
    params = init_up_conv_params(kp, in_ch, out_ch)

    # batch=2, 64 channels, 16x16 spatial -> output (2, 32, 32, 32)
    x = jax.random.normal(kx, (2, in_ch, 16, 16), jnp.float32)

    out = up_conv_forward(params, x)
    out = jax.block_until_ready(out)

    assert out.shape == (2, out_ch, 32, 32), out.shape
    assert bool(jnp.all(jnp.isfinite(out)))

    ref = jax.block_until_ready(up_conv_reference(params, x))
    max_err = float(jnp.max(jnp.abs(out - ref)))
    assert bool(jnp.allclose(out, ref, rtol=5e-2, atol=5e-2)), max_err

    print("KERNEL_OK")
</pallas_src>

<mosaic_0001>
module attributes {stable_mosaic.version = 11 : i64} {
  func.func @_up_conv_kernel(%arg0: i32, %arg1: i32, %arg2: i32, %arg3: memref<1x1x18x64xbf16, #tpu.memory_space<vmem>>, %arg4: memref<1x1x18x64xbf16, #tpu.memory_space<vmem>>, %arg5: memref<1x1x18x64xbf16, #tpu.memory_space<vmem>>, %arg6: memref<16x64x32xbf16, #tpu.memory_space<vmem>>, %arg7: memref<2x32xf32, #tpu.memory_space<vmem>>, %arg8: memref<1x2x2x16x32xf32, #tpu.memory_space<vmem>>) attributes {dimension_semantics = [#tpu.dimension_semantics<parallel>, #tpu.dimension_semantics<parallel>, #tpu.dimension_semantics<arbitrary>], iteration_bounds = array<i64: 2, 1, 16>, scalar_prefetch = 0 : i64, scratch_operands = 0 : i64, tpu.core_type = #tpu.core_type<tc>, window_params = [{transform_indices = @transform_0, window_bounds = array<i64: 1, 1, 18, 64>}, {transform_indices = @transform_1, window_bounds = array<i64: 1, 1, 18, 64>}, {transform_indices = @transform_2, window_bounds = array<i64: 1, 1, 18, 64>}, {transform_indices = @transform_3, window_bounds = array<i64: 16, 64, 32>}, {transform_indices = @transform_4, window_bounds = array<i64: 2, 32>}, {transform_indices = @transform_5, window_bounds = array<i64: 1, 2, 2, 16, 32>}]} {
    %c0 = arith.constant 0 : index
    %c0_0 = arith.constant 0 : index
    %c0_1 = arith.constant 0 : index
    %c0_2 = arith.constant 0 : index
    %0 = vector.load %arg3[%c0, %c0_0, %c0_1, %c0_2] : memref<1x1x18x64xbf16, #tpu.memory_space<vmem>>, vector<1x1x18x64xbf16>
    %1 = vector.shape_cast %0 : vector<1x1x18x64xbf16> to vector<18x64xbf16>
    %c0_3 = arith.constant 0 : index
    %c0_4 = arith.constant 0 : index
    %c0_5 = arith.constant 0 : index
    %c0_6 = arith.constant 0 : index
    %2 = vector.load %arg4[%c0_3, %c0_4, %c0_5, %c0_6] : memref<1x1x18x64xbf16, #tpu.memory_space<vmem>>, vector<1x1x18x64xbf16>
    %3 = vector.shape_cast %2 : vector<1x1x18x64xbf16> to vector<18x64xbf16>
    %c0_7 = arith.constant 0 : index
    %c0_8 = arith.constant 0 : index
    %c0_9 = arith.constant 0 : index
    %c0_10 = arith.constant 0 : index
    %4 = vector.load %arg5[%c0_7, %c0_8, %c0_9, %c0_10] : memref<1x1x18x64xbf16, #tpu.memory_space<vmem>>, vector<1x1x18x64xbf16>
    %5 = vector.shape_cast %4 : vector<1x1x18x64xbf16> to vector<18x64xbf16>
    %6 = vector.extract_strided_slice %1 {offsets = [0, 0], sizes = [16, 64], strides = [1, 1]} : vector<18x64xbf16> to vector<16x64xbf16>
    %7 = vector.extract_strided_slice %1 {offsets = [1, 0], sizes = [16, 64], strides = [1, 1]} : vector<18x64xbf16> to vector<16x64xbf16>
    %8 = vector.extract_strided_slice %1 {offsets = [2, 0], sizes = [16, 64], strides = [1, 1]} : vector<18x64xbf16> to vector<16x64xbf16>
    %9 = vector.extract_strided_slice %3 {offsets = [0, 0], sizes = [16, 64], strides = [1, 1]} : vector<18x64xbf16> to vector<16x64xbf16>
    %10 = vector.extract_strided_slice %3 {offsets = [1, 0], sizes = [16, 64], strides = [1, 1]} : vector<18x64xbf16> to vector<16x64xbf16>
    %11 = vector.extract_strided_slice %3 {offsets = [2, 0], sizes = [16, 64], strides = [1, 1]} : vector<18x64xbf16> to vector<16x64xbf16>
    %12 = vector.extract_strided_slice %5 {offsets = [0, 0], sizes = [16, 64], strides = [1, 1]} : vector<18x64xbf16> to vector<16x64xbf16>
    %13 = vector.extract_strided_slice %5 {offsets = [1, 0], sizes = [16, 64], strides = [1, 1]} : vector<18x64xbf16> to vector<16x64xbf16>
    %14 = vector.extract_strided_slice %5 {offsets = [2, 0], sizes = [16, 64], strides = [1, 1]} : vector<18x64xbf16> to vector<16x64xbf16>
    %c0_11 = arith.constant 0 : index
    %c0_12 = arith.constant 0 : index
    %15 = vector.load %arg7[%c0_11, %c0_12] : memref<2x32xf32, #tpu.memory_space<vmem>>, vector<1x32xf32>
    %c1 = arith.constant 1 : index
    %c0_13 = arith.constant 0 : index
    %16 = vector.load %arg7[%c1, %c0_13] : memref<2x32xf32, #tpu.memory_space<vmem>>, vector<1x32xf32>
    %cst = arith.constant 0.000000e+00 : f32
    %17 = vector.broadcast %cst : f32 to vector<16x32xf32>
    %c0_14 = arith.constant 0 : index
    %c0_15 = arith.constant 0 : index
    %c0_16 = arith.constant 0 : index
    %18 = vector.load %arg6[%c0_14, %c0_15, %c0_16] : memref<16x64x32xbf16, #tpu.memory_space<vmem>>, vector<1x64x32xbf16>
    %19 = vector.shape_cast %18 : vector<1x64x32xbf16> to vector<64x32xbf16>
    %cst_17 = arith.constant dense<0.000000e+00> : vector<16x32xf32>
    %20 = tpu.matmul %6, %19, %cst_17 {dimension_numbers = #tpu.dot_dimension_numbers<[1], [0], [0], [1], [0, 0, 1, 1], [], []>} : vector<16x64xbf16>, vector<64x32xbf16>, vector<16x32xf32> -> vector<16x32xf32>
    %21 = arith.addf %17, %20 : vector<16x32xf32>
    %c1_18 = arith.constant 1 : index
    %c0_19 = arith.constant 0 : index
    %c0_20 = arith.constant 0 : index
    %22 = vector.load %arg6[%c1_18, %c0_19, %c0_20] : memref<16x64x32xbf16, #tpu.memory_space<vmem>>, vector<1x64x32xbf16>
    %23 = vector.shape_cast %22 : vector<1x64x32xbf16> to vector<64x32xbf16>
    %cst_21 = arith.constant dense<0.000000e+00> : vector<16x32xf32>
    %24 = tpu.matmul %7, %23, %cst_21 {dimension_numbers = #tpu.dot_dimension_numbers<[1], [0], [0], [1], [0, 0, 1, 1], [], []>} : vector<16x64xbf16>, vector<64x32xbf16>, vector<16x32xf32> -> vector<16x32xf32>
    %25 = arith.addf %21, %24 : vector<16x32xf32>
    %c4 = arith.constant 4 : index
    %c0_22 = arith.constant 0 : index
    %c0_23 = arith.constant 0 : index
    %26 = vector.load %arg6[%c4, %c0_22, %c0_23] : memref<16x64x32xbf16, #tpu.memory_space<vmem>>, vector<1x64x32xbf16>
    %27 = vector.shape_cast %26 : vector<1x64x32xbf16> to vector<64x32xbf16>
    %cst_24 = arith.constant dense<0.000000e+00> : vector<16x32xf32>
    %28 = tpu.matmul %9, %27, %cst_24 {dimension_numbers = #tpu.dot_dimension_numbers<[1], [0], [0], [1], [0, 0, 1, 1], [], []>} : vector<16x64xbf16>, vector<64x32xbf16>, vector<16x32xf32> -> vector<16x32xf32>
    %29 = arith.addf %25, %28 : vector<16x32xf32>
    %c5 = arith.constant 5 : index
    %c0_25 = arith.constant 0 : index
    %c0_26 = arith.constant 0 : index
    %30 = vector.load %arg6[%c5, %c0_25, %c0_26] : memref<16x64x32xbf16, #tpu.memory_space<vmem>>, vector<1x64x32xbf16>
    %31 = vector.shape_cast %30 : vector<1x64x32xbf16> to vector<64x32xbf16>
    %cst_27 = arith.constant dense<0.000000e+00> : vector<16x32xf32>
    %32 = tpu.matmul %10, %31, %cst_27 {dimension_numbers = #tpu.dot_dimension_numbers<[1], [0], [0], [1], [0, 0, 1, 1], [], []>} : vector<16x64xbf16>, vector<64x32xbf16>, vector<16x32xf32> -> vector<16x32xf32>
    %33 = arith.addf %29, %32 : vector<16x32xf32>
    %34 = vector.broadcast %15 : vector<1x32xf32> to vector<16x32xf32>
    %35 = arith.mulf %33, %34 : vector<16x32xf32>
    %36 = vector.broadcast %16 : vector<1x32xf32> to vector<16x32xf32>
    %37 = arith.addf %35, %36 : vector<16x32xf32>
    %cst_28 = arith.constant 0.000000e+00 : f32
    %38 = vector.broadcast %cst_28 : f32 to vector<16x32xf32>
    %39 = arith.maximumf %37, %38 : vector<16x32xf32>
    %c0_29 = arith.constant 0 : index
    %c0_30 = arith.constant 0 : index
    %c0_31 = arith.constant 0 : index
    %c0_32 = arith.constant 0 : index
    %c0_33 = arith.constant 0 : index
    %40 = vector.load %arg8[%c0_29, %c0_30, %c0_31, %c0_32, %c0_33] : memref<1x2x2x16x32xf32, #tpu.memory_space<vmem>>, vector<1x1x1x16x32xf32>
    %41 = vector.shape_cast %40 : vector<1x1x1x16x32xf32> to vector<16x32xf32>
    %42 = vector.shape_cast %39 : vector<16x32xf32> to vector<1x1x1x16x32xf32>
    tpu.vector_store %arg8[%c0_29, %c0_30, %c0_31, %c0_32, %c0_33], %42 {strides = array<i32>} : memref<1x2x2x16x32xf32, #tpu.memory_space<vmem>>, vector<1x1x1x16x32xf32>,
    %cst_34 = arith.constant 0.000000e+00 : f32
    %43 = vector.broadcast %cst_34 : f32 to vector<16x32xf32>
    %c2 = arith.constant 2 : index
    %c0_35 = arith.constant 0 : index
    %c0_36 = arith.constant 0 : index
    %44 = vector.load %arg6[%c2, %c0_35, %c0_36] : memref<16x64x32xbf16, #tpu.memory_space<vmem>>, vector<1x64x32xbf16>
    %45 = vector.shape_cast %44 : vector<1x64x32xbf16> to vector<64x32xbf16>
    %cst_37 = arith.constant dense<0.000000e+00> : vector<16x32xf32>
    %46 = tpu.matmul %7, %45, %cst_37 {dimension_numbers = #tpu.dot_dimension_numbers<[1], [0], [0], [1], [0, 0, 1, 1], [], []>} : vector<16x64xbf16>, vector<64x32xbf16>, vector<16x32xf32> -> vector<16x32xf32>
    %47 = arith.addf %43, %46 : vector<16x32xf32>
    %c3 = arith.constant 3 : index
    %c0_38 = arith.constant 0 : index
    %c0_39 = arith.constant 0 : index
    %48 = vector.load %arg6[%c3, %c0_38, %c0_39] : memref<16x64x32xbf16, #tpu.memory_space<vmem>>, vector<1x64x32xbf16>
    %49 = vector.shape_cast %48 : vector<1x64x32xbf16> to vector<64x32xbf16>
    %cst_40 = arith.constant dense<0.000000e+00> : vector<16x32xf32>
    %50 = tpu.matmul %8, %49, %cst_40 {dimension_numbers = #tpu.dot_dimension_numbers<[1], [0], [0], [1], [0, 0, 1, 1], [], []>} : vector<16x64xbf16>, vector<64x32xbf16>, vector<16x32xf32> -> vector<16x32xf32>
    %51 = arith.addf %47, %50 : vector<16x32xf32>
    %c6 = arith.constant 6 : index
    %c0_41 = arith.constant 0 : index
    %c0_42 = arith.constant 0 : index
    %52 = vector.load %arg6[%c6, %c0_41, %c0_42] : memref<16x64x32xbf16, #tpu.memory_space<vmem>>, vector<1x64x32xbf16>
    %53 = vector.shape_cast %52 : vector<1x64x32xbf16> to vector<64x32xbf16>
    %cst_43 = arith.constant dense<0.000000e+00> : vector<16x32xf32>
    %54 = tpu.matmul %10, %53, %cst_43 {dimension_numbers = #tpu.dot_dimension_numbers<[1], [0], [0], [1], [0, 0, 1, 1], [], []>} : vector<16x64xbf16>, vector<64x32xbf16>, vector<16x32xf32> -> vector<16x32xf32>
    %55 = arith.addf %51, %54 : vector<16x32xf32>
    %c7 = arith.constant 7 : index
    %c0_44 = arith.constant 0 : index
    %c0_45 = arith.constant 0 : index
    %56 = vector.load %arg6[%c7, %c0_44, %c0_45] : memref<16x64x32xbf16, #tpu.memory_space<vmem>>, vector<1x64x32xbf16>
    %57 = vector.shape_cast %56 : vector<1x64x32xbf16> to vector<64x32xbf16>
    %cst_46 = arith.constant dense<0.000000e+00> : vector<16x32xf32>
    %58 = tpu.matmul %11, %57, %cst_46 {dimension_numbers = #tpu.dot_dimension_numbers<[1], [0], [0], [1], [0, 0, 1, 1], [], []>} : vector<16x64xbf16>, vector<64x32xbf16>, vector<16x32xf32> -> vector<16x32xf32>
    %59 = arith.addf %55, %58 : vector<16x32xf32>
    %60 = vector.broadcast %15 : vector<1x32xf32> to vector<16x32xf32>
    %61 = arith.mulf %59, %60 : vector<16x32xf32>
    %62 = vector.broadcast %16 : vector<1x32xf32> to vector<16x32xf32>
    %63 = arith.addf %61, %62 : vector<16x32xf32>
    %cst_47 = arith.constant 0.000000e+00 : f32
    %64 = vector.broadcast %cst_47 : f32 to vector<16x32xf32>
    %65 = arith.maximumf %63, %64 : vector<16x32xf32>
    %c0_48 = arith.constant 0 : index
    %c0_49 = arith.constant 0 : index
    %c1_50 = arith.constant 1 : index
    %c0_51 = arith.constant 0 : index
    %c0_52 = arith.constant 0 : index
    %66 = vector.load %arg8[%c0_48, %c0_49, %c1_50, %c0_51, %c0_52] : memref<1x2x2x16x32xf32, #tpu.memory_space<vmem>>, vector<1x1x1x16x32xf32>
    %67 = vector.shape_cast %66 : vector<1x1x1x16x32xf32> to vector<16x32xf32>
    %68 = vector.shape_cast %65 : vector<16x32xf32> to vector<1x1x1x16x32xf32>
    tpu.vector_store %arg8[%c0_48, %c0_49, %c1_50, %c0_51, %c0_52], %68 {strides = array<i32>} : memref<1x2x2x16x32xf32, #tpu.memory_space<vmem>>, vector<1x1x1x16x32xf32>,
    %cst_53 = arith.constant 0.000000e+00 : f32
    %69 = vector.broadcast %cst_53 : f32 to vector<16x32xf32>
    %c8 = arith.constant 8 : index
    %c0_54 = arith.constant 0 : index
    %c0_55 = arith.constant 0 : index
    %70 = vector.load %arg6[%c8, %c0_54, %c0_55] : memref<16x64x32xbf16, #tpu.memory_space<vmem>>, vector<1x64x32xbf16>
    %71 = vector.shape_cast %70 : vector<1x64x32xbf16> to vector<64x32xbf16>
    %cst_56 = arith.constant dense<0.000000e+00> : vector<16x32xf32>
    %72 = tpu.matmul %9, %71, %cst_56 {dimension_numbers = #tpu.dot_dimension_numbers<[1], [0], [0], [1], [0, 0, 1, 1], [], []>} : vector<16x64xbf16>, vector<64x32xbf16>, vector<16x32xf32> -> vector<16x32xf32>
    %73 = arith.addf %69, %72 : vector<16x32xf32>
    %c9 = arith.constant 9 : index
    %c0_57 = arith.constant 0 : index
    %c0_58 = arith.constant 0 : index
    %74 = vector.load %arg6[%c9, %c0_57, %c0_58] : memref<16x64x32xbf16, #tpu.memory_space<vmem>>, vector<1x64x32xbf16>
    %75 = vector.shape_cast %74 : vector<1x64x32xbf16> to vector<64x32xbf16>
    %cst_59 = arith.constant dense<0.000000e+00> : vector<16x32xf32>
    %76 = tpu.matmul %10, %75, %cst_59 {dimension_numbers = #tpu.dot_dimension_numbers<[1], [0], [0], [1], [0, 0, 1, 1], [], []>} : vector<16x64xbf16>, vector<64x32xbf16>, vector<16x32xf32> -> vector<16x32xf32>
    %77 = arith.addf %73, %76 : vector<16x32xf32>
    %c12 = arith.constant 12 : index
    %c0_60 = arith.constant 0 : index
    %c0_61 = arith.constant 0 : index
    %78 = vector.load %arg6[%c12, %c0_60, %c0_61] : memref<16x64x32xbf16, #tpu.memory_space<vmem>>, vector<1x64x32xbf16>
    %79 = vector.shape_cast %78 : vector<1x64x32xbf16> to vector<64x32xbf16>
    %cst_62 = arith.constant dense<0.000000e+00> : vector<16x32xf32>
    %80 = tpu.matmul %12, %79, %cst_62 {dimension_numbers = #tpu.dot_dimension_numbers<[1], [0], [0], [1], [0, 0, 1, 1], [], []>} : vector<16x64xbf16>, vector<64x32xbf16>, vector<16x32xf32> -> vector<16x32xf32>
    %81 = arith.addf %77, %80 : vector<16x32xf32>
    %c13 = arith.constant 13 : index
    %c0_63 = arith.constant 0 : index
    %c0_64 = arith.constant 0 : index
    %82 = vector.load %arg6[%c13, %c0_63, %c0_64] : memref<16x64x32xbf16, #tpu.memory_space<vmem>>, vector<1x64x32xbf16>
    %83 = vector.shape_cast %82 : vector<1x64x32xbf16> to vector<64x32xbf16>
    %cst_65 = arith.constant dense<0.000000e+00> : vector<16x32xf32>
    %84 = tpu.matmul %13, %83, %cst_65 {dimension_numbers = #tpu.dot_dimension_numbers<[1], [0], [0], [1], [0, 0, 1, 1], [], []>} : vector<16x64xbf16>, vector<64x32xbf16>, vector<16x32xf32> -> vector<16x32xf32>
    %85 = arith.addf %81, %84 : vector<16x32xf32>
    %86 = vector.broadcast %15 : vector<1x32xf32> to vector<16x32xf32>
    %87 = arith.mulf %85, %86 : vector<16x32xf32>
    %88 = vector.broadcast %16 : vector<1x32xf32> to vector<16x32xf32>
    %89 = arith.addf %87, %88 : vector<16x32xf32>
    %cst_66 = arith.constant 0.000000e+00 : f32
    %90 = vector.broadcast %cst_66 : f32 to vector<16x32xf32>
    %91 = arith.maximumf %89, %90 : vector<16x32xf32>
    %c0_67 = arith.constant 0 : index
    %c1_68 = arith.constant 1 : index
    %c0_69 = arith.constant 0 : index
    %c0_70 = arith.constant 0 : index
    %c0_71 = arith.constant 0 : index
    %92 = vector.load %arg8[%c0_67, %c1_68, %c0_69, %c0_70, %c0_71] : memref<1x2x2x16x32xf32, #tpu.memory_space<vmem>>, vector<1x1x1x16x32xf32>
    %93 = vector.shape_cast %92 : vector<1x1x1x16x32xf32> to vector<16x32xf32>
    %94 = vector.shape_cast %91 : vector<16x32xf32> to vector<1x1x1x16x32xf32>
    tpu.vector_store %arg8[%c0_67, %c1_68, %c0_69, %c0_70, %c0_71], %94 {strides = array<i32>} : memref<1x2x2x16x32xf32, #tpu.memory_space<vmem>>, vector<1x1x1x16x32xf32>,
    %cst_72 = arith.constant 0.000000e+00 : f32
    %95 = vector.broadcast %cst_72 : f32 to vector<16x32xf32>
    %c10 = arith.constant 10 : index
    %c0_73 = arith.constant 0 : index
    %c0_74 = arith.constant 0 : index
    %96 = vector.load %arg6[%c10, %c0_73, %c0_74] : memref<16x64x32xbf16, #tpu.memory_space<vmem>>, vector<1x64x32xbf16>
    %97 = vector.shape_cast %96 : vector<1x64x32xbf16> to vector<64x32xbf16>
    %cst_75 = arith.constant dense<0.000000e+00> : vector<16x32xf32>
    %98 = tpu.matmul %10, %97, %cst_75 {dimension_numbers = #tpu.dot_dimension_numbers<[1], [0], [0], [1], [0, 0, 1, 1], [], []>} : vector<16x64xbf16>, vector<64x32xbf16>, vector<16x32xf32> -> vector<16x32xf32>
    %99 = arith.addf %95, %98 : vector<16x32xf32>
    %c11 = arith.constant 11 : index
    %c0_76 = arith.constant 0 : index
    %c0_77 = arith.constant 0 : index
    %100 = vector.load %arg6[%c11, %c0_76, %c0_77] : memref<16x64x32xbf16, #tpu.memory_space<vmem>>, vector<1x64x32xbf16>
    %101 = vector.shape_cast %100 : vector<1x64x32xbf16> to vector<64x32xbf16>
    %cst_78 = arith.constant dense<0.000000e+00> : vector<16x32xf32>
    %102 = tpu.matmul %11, %101, %cst_78 {dimension_numbers = #tpu.dot_dimension_numbers<[1], [0], [0], [1], [0, 0, 1, 1], [], []>} : vector<16x64xbf16>, vector<64x32xbf16>, vector<16x32xf32> -> vector<16x32xf32>
    %103 = arith.addf %99, %102 : vector<16x32xf32>
    %c14 = arith.constant 14 : index
    %c0_79 = arith.constant 0 : index
    %c0_80 = arith.constant 0 : index
    %104 = vector.load %arg6[%c14, %c0_79, %c0_80] : memref<16x64x32xbf16, #tpu.memory_space<vmem>>, vector<1x64x32xbf16>
    %105 = vector.shape_cast %104 : vector<1x64x32xbf16> to vector<64x32xbf16>
    %cst_81 = arith.constant dense<0.000000e+00> : vector<16x32xf32>
    %106 = tpu.matmul %13, %105, %cst_81 {dimension_numbers = #tpu.dot_dimension_numbers<[1], [0], [0], [1], [0, 0, 1, 1], [], []>} : vector<16x64xbf16>, vector<64x32xbf16>, vector<16x32xf32> -> vector<16x32xf32>
    %107 = arith.addf %103, %106 : vector<16x32xf32>
    %c15 = arith.constant 15 : index
    %c0_82 = arith.constant 0 : index
    %c0_83 = arith.constant 0 : index
    %108 = vector.load %arg6[%c15, %c0_82, %c0_83] : memref<16x64x32xbf16, #tpu.memory_space<vmem>>, vector<1x64x32xbf16>
    %109 = vector.shape_cast %108 : vector<1x64x32xbf16> to vector<64x32xbf16>
    %cst_84 = arith.constant dense<0.000000e+00> : vector<16x32xf32>
    %110 = tpu.matmul %14, %109, %cst_84 {dimension_numbers = #tpu.dot_dimension_numbers<[1], [0], [0], [1], [0, 0, 1, 1], [], []>} : vector<16x64xbf16>, vector<64x32xbf16>, vector<16x32xf32> -> vector<16x32xf32>
    %111 = arith.addf %107, %110 : vector<16x32xf32>
    %112 = vector.broadcast %15 : vector<1x32xf32> to vector<16x32xf32>
    %113 = arith.mulf %111, %112 : vector<16x32xf32>
    %114 = vector.broadcast %16 : vector<1x32xf32> to vector<16x32xf32>
    %115 = arith.addf %113, %114 : vector<16x32xf32>
    %cst_85 = arith.constant 0.000000e+00 : f32
    %116 = vector.broadcast %cst_85 : f32 to vector<16x32xf32>
    %117 = arith.maximumf %115, %116 : vector<16x32xf32>
    %c0_86 = arith.constant 0 : index
    %c1_87 = arith.constant 1 : index
    %c1_88 = arith.constant 1 : index
    %c0_89 = arith.constant 0 : index
    %c0_90 = arith.constant 0 : index
    %118 = vector.load %arg8[%c0_86, %c1_87, %c1_88, %c0_89, %c0_90] : memref<1x2x2x16x32xf32, #tpu.memory_space<vmem>>, vector<1x1x1x16x32xf32>
    %119 = vector.shape_cast %118 : vector<1x1x1x16x32xf32> to vector<16x32xf32>
    %120 = vector.shape_cast %117 : vector<16x32xf32> to vector<1x1x1x16x32xf32>
    tpu.vector_store %arg8[%c0_86, %c1_87, %c1_88, %c0_89, %c0_90], %120 {strides = array<i32>} : memref<1x2x2x16x32xf32, #tpu.memory_space<vmem>>, vector<1x1x1x16x32xf32>,
    return
  }
  func.func @transform_0(%arg0: i32, %arg1: i32, %arg2: i32) -> (i32, i32, i32, i32) {
    %c0_i32 = arith.constant 0 : i32
    %0 = arith.addi %arg2, %c0_i32 : i32
    %c0_i32_0 = arith.constant 0 : i32
    %c0_i32_1 = arith.constant 0 : i32
    %c0_i32_2 = arith.constant 0 : i32
    return %arg0, %0, %c0_i32_0, %c0_i32_1 : i32, i32, i32, i32
  }
  func.func @transform_1(%arg0: i32, %arg1: i32, %arg2: i32) -> (i32, i32, i32, i32) {
    %c1_i32 = arith.constant 1 : i32
    %0 = arith.addi %arg2, %c1_i32 : i32
    %c0_i32 = arith.constant 0 : i32
    %c0_i32_0 = arith.constant 0 : i32
    %c0_i32_1 = arith.constant 0 : i32
    return %arg0, %0, %c0_i32, %c0_i32_0 : i32, i32, i32, i32
  }
  func.func @transform_2(%arg0: i32, %arg1: i32, %arg2: i32) -> (i32, i32, i32, i32) {
    %c2_i32 = arith.constant 2 : i32
    %0 = arith.addi %arg2, %c2_i32 : i32
    %c0_i32 = arith.constant 0 : i32
    %c0_i32_0 = arith.constant 0 : i32
    %c0_i32_1 = arith.constant 0 : i32
    return %arg0, %0, %c0_i32, %c0_i32_0 : i32, i32, i32, i32
  }
  func.func @transform_3(%arg0: i32, %arg1: i32, %arg2: i32) -> (i32, i32, i32) {
    %c0_i32 = arith.constant 0 : i32
    %c0_i32_0 = arith.constant 0 : i32
    %c0_i32_1 = arith.constant 0 : i32
    return %c0_i32, %c0_i32_0, %arg1 : i32, i32, i32
  }
  func.func @transform_4(%arg0: i32, %arg1: i32, %arg2: i32) -> (i32, i32) {
    %c0_i32 = arith.constant 0 : i32
    %c0_i32_0 = arith.constant 0 : i32
    return %c0_i32, %arg1 : i32, i32
  }
  func.func @transform_5(%arg0: i32, %arg1: i32, %arg2: i32) -> (i32, i32, i32, i32, i32) {
    %c0_i32 = arith.constant 0 : i32
    %c0_i32_0 = arith.constant 0 : i32
    %c0_i32_1 = arith.constant 0 : i32
    return %arg0, %arg2, %c0_i32, %c0_i32_0, %arg1 : i32, i32, i32, i32, i32
  }
}

</mosaic_0001>

<bundles_post_ra>
// kernel: up_conv_forward.1
= control target key start
LH: loop header
LB: loop body
LE: loop exit
PB: predicated region body
PF: predicated region fallthrough
CT: control target
= control target key end

     0   :  { %s2668_s18 = smov 0   ;;  %s2670_s19 = smov 0   ;;  %s3112_s0 = inlined_call_operand.vmem [shape: bf16[2,18,18,64], index: 0, kind: input, shape index: {}, may-alias: {0,1,2}]   ;;  %s3113_s1 = inlined_call_operand.vmem [shape: bf16[2,18,18,64], index: 1, kind: input, shape index: {}, may-alias: {0,1,2}]   ;;  %s3114_s2 = inlined_call_operand.vmem [shape: bf16[2,18,18,64], index: 2, kind: input, shape index: {}, may-alias: {0,1,2}]   ;;  %s3115_s3 = inlined_call_operand.vmem [shape: bf16[16,64,32], index: 3, kind: input, shape index: {}]   ;;  %s3116_s4 = inlined_call_operand.vmem [shape: f32[2,32], index: 4, kind: input, shape index: {}]   ;;  %s3117_s5 = inlined_call_operand.vmem [shape: f32[2,32,2,16,32], index: 5, kind: output, shape index: {}]  }
   0x1   :  { %s2672_s20 = smov 0   ;;  %s2674_s21 = smov 0  }
   0x2   :  { %s2676_s22 = smov 0  }
   0x3 LB: > { %s27_s23 = sadd.s32 1, %s2626_s20  ;;  %s34_s24 = sadd.s32 1, %s2630_s21  ;;  %s2634_s22 = sphi %s2676_s22, %s15_s22   ;;  %s2630_s21 = sphi %s2674_s21, %s3121_s21   ;;  %s2626_s20 = sphi %s2672_s20, %s3120_s20   ;;  %s2622_s19 = sphi %s2670_s19, %s3119_s19   ;;  %s2618_s18 = sphi %s2668_s18, %s3118_s18  }
   0x4   : > { %p28_p0 = scmp.ge.s32.totalorder %s27_s23, 16  ;;  %p1936_p1 = scmp.ge.s32.totalorder %s2634_s22, 1 }
   0x5   : > { %p274_p2 = scmp.lt.s32.totalorder %s2634_s22, 33 }
   0x6   : > { %s3123_s23 = smov (%p28_p0, %s27_s23), 0  ;;  %s3125_s24 = smov (!%p28_p0, %s34_s24), %s2630_s21 }
   0x7   : > { %p275_p3 = pnand %p1936_p1, %p274_p2  ;;  %p36_p4 = scmp.ge.s32.totalorder %s3125_s24, 2 }
   0x8   : > { %v2526_v0 = vld [vmem:[%s3115_s3 + $0x20] sm:$0xff] (!%p275_p3)   ;;  %v2636_v1 = vmov (!%p275_p3), 0.0   ;;  %v2528_v3 = vld [vmem:[%s3115_s3 + $0x28] sm:$0xff] (!%p275_p3)   ;;  %vm2637_vm0 = vmmov (!%p275_p3), 0   ;;  %p342_p5 = scmp.lt.s32.totalorder (!%p275_p3), %s2622_s19, 1  ;;  %p344_p6 = scmp.lt.s32.totalorder (!%p275_p3), %s2618_s18, 17 }
   0x9   : > { %s3127_s24 = smov (%p36_p4, %s3125_s24), 0  ;;  %278 = sbr.rel (%p275_p3) target bundleno = 365 (0x16d), region = 40 }
   0xa   : > { %2240 = vmatprep.subr.bf16.mxu0 (!%p275_p3), %v2636_v1  ;;  %2288 = vmatprep.subr.bf16.mxu1 (!%p275_p3), %v2636_v1  ;;  %v2527_v2 = vld [vmem:[%s3115_s3 + $0x60] sm:$0xff] (!%p275_p3)   ;;  %v2529_v4 = vld [vmem:[%s3115_s3 + $0x68] sm:$0xff] (!%p275_p3)   ;;  %v2530_v5 = vld [vmem:[%s3115_s3 + $0x30] sm:$0xff] (!%p275_p3)   ;;  %vm469_vm1 = vcmask (!%p275_p3), 523264   ;;  %vm793_vm2 = vcmask (!%p275_p3), 1046528   ;;  %s362_s28 = sadd.s32 (!%p275_p3), 2, %s2618_s18 }
   0xb   : > { %2241 = vmatpush3.bf16.msra.mxu0 (!%p275_p3), %v2526_v0  ;;  %2248 = vmatprep.mubr.msk.bf16.mxu0 (!%p275_p3), %vm2637_vm0, %v2636_v1  ;;  %v2531_v6 = vld [vmem:[%s3115_s3 + $0x70] sm:$0xff] (!%p275_p3)   ;;  %v2532_v7 = vld [vmem:[%s3115_s3 + $0x38] sm:$0xff] (!%p275_p3)   ;;  %v2537_v14 = vld [vmem:[%s3115_s3 + $0x40] sm:$0xff] (!%p275_p3)   ;;  %vm432_vm3 = vsmask.f32 (!%p275_p3), 7424  ;;  %p365_p8 = scmp.lt.s32.totalorder (!%p275_p3), %s362_s28, 17 }
   0xc   : > { %2289 = vmatpush3.bf16.msra.mxu1 (!%p275_p3), %v2527_v2  ;;  %2242 = vmatprep.subr.bf16.mxu0 (!%p275_p3), %v2636_v1  ;;  %v2533_v8 = vld [vmem:[%s3115_s3 + $0x78] sm:$0xff] (!%p275_p3)   ;;  %v2536_v19 = vld [vmem:[%s3115_s3] sm:$0xff] (!%p275_p3)   ;;  %v2539_v22 = vld [vmem:[%s3115_s3 + $0x48] sm:$0xff] (!%p275_p3)   ;;  %vm772_vm4 = vcmask (!%p275_p3), 261120  }
   0xd   : > { %2290 = vmatprep.subr.bf16.mxu1 (!%p275_p3), %v2636_v1  ;;  %2296 = vmatprep.mubr.msk.bf16.mxu1 (!%p275_p3), %vm2637_vm0, %v2636_v1  ;;  %v2538_v24 = vld [vmem:[%s3115_s3 + $0x8] sm:$0xff] (!%p275_p3)   ;;  %v2541_v25 = vld [vmem:[%s3115_s3 + $0x50] sm:$0xff] (!%p275_p3)   ;;  %v2543_v27 = vld [vmem:[%s3115_s3 + $0x58] sm:$0xff] (!%p275_p3)  }
   0xe   : > { %v2540_v26 = vld [vmem:[%s3115_s3 + $0x10] sm:$0xff] (!%p275_p3)   ;;  %v2542_v28 = vld [vmem:[%s3115_s3 + $0x18] sm:$0xff] (!%p275_p3)   ;;  %v2545_v29 = vld [vmem:[%s3115_s3 + $0xc0] sm:$0xff] (!%p275_p3)  }
   0xf   : > { %2243 = vmatpush3.bf16.msra.mxu0 (!%p275_p3), %v2528_v3  ;;  %v2544_v32 = vld [vmem:[%s3115_s3 + $0x80] sm:$0xff] (!%p275_p3)   ;;  %v2547_v33 = vld [vmem:[%s3115_s3 + $0xc8] sm:$0xff] (!%p275_p3)   ;;  %v2549_v36 = vld [vmem:[%s3115_s3 + $0xd0] sm:$0xff] (!%p275_p3)  }
  0x10   : > { %s3129_s19 = smov (!%p342_p5, %s2622_s19), 1  ;;  %2291 = vmatpush3.bf16.msra.mxu1 %v2529_v4  ;;  %2244 = vmatprep.subr.bf16.mxu0 %v2636_v1  ;;  %v2546_v35 = vld [vmem:[%s3115_s3 + $0x88] sm:$0xff]   ;;  %v2548_v40 = vld [vmem:[%s3115_s3 + $0x90] sm:$0xff]   ;;  %v2551_v41 = vld [vmem:[%s3115_s3 + $0xd8] sm:$0xff]   ;;  %s3133_s28 = smov (!%p365_p8, %s362_s28), 17 }
  0x11   : > { %s345_s8 = scalar_select %p344_p6, %s2618_s18, 17  ;;  %2292 = vmatprep.subr.bf16.mxu1 %v2636_v1  ;;  %v2550_v44 = vld [vmem:[%s3115_s3 + $0x98] sm:$0xff]   ;;  %v2555_v46 = vld [vmem:[%s3115_s3 + $0xe0] sm:$0xff]   ;;  %v2557_v48 = vld [vmem:[%s3115_s3 + $0xe8] sm:$0xff]  }
  0x12   : > { %s2732_s11 = smul.u32 54, %s3129_s19  ;;  %v2553_v47 = vld [vmem:[%s3115_s3 + $0xa0] sm:$0xff]   ;;  %v2556_v49 = vld [vmem:[%s3115_s3 + $0xa8] sm:$0xff]   ;;  %v2559_v50 = vld [vmem:[%s3115_s3 + $0xf0] sm:$0xff]   ;;  %s1942_s12 = sshll.u32 %s3129_s19, 7 }
  0x13   : > { %s2480_s14 = smul.u32 3, %s345_s8  ;;  %2245 = vmatpush3.bf16.msra.mxu0 %v2530_v5  ;;  %s351_s8 = sadd.s32 1, %s2618_s18  ;;  %v2558_v51 = vld [vmem:[%s3115_s3 + $0xb0] sm:$0xff]   ;;  %v2561_v53 = vld [vmem:[%s3115_s3 + $0xf8] sm:$0xff]   ;;  %v2563_v57 = vld [vmem:[%s3115_s3 + $0x160] sm:$0xff]  }
  0x14   : > { %2293 = vmatpush3.bf16.msra.mxu1 %v2531_v6  ;;  %2246 = vmatprep.subr.bf16.mxu0 %v2636_v1  ;;  %p354_p7 = scmp.lt.s32.totalorder %s351_s8, 17  ;;  %s2483_s17 = smul.u32 3, %s3133_s28  ;;  %v2560_v55 = vld [vmem:[%s3115_s3 + $0xb8] sm:$0xff]   ;;  %v2562_v58 = vld [vmem:[%s3115_s3 + $0x120] sm:$0xff]   ;;  %v2565_v59 = vld [vmem:[%s3115_s3 + $0x168] sm:$0xff]  }
  0x15   : > { %s348_s15 = sadd.s32 %s2732_s11, %s2480_s14  ;;  %2294 = vmatprep.subr.bf16.mxu1 %v2636_v1  ;;  %v2564_v60 = vld [vmem:[%s3115_s3 + $0x128] sm:$0xff]   ;;  %v2567_v61 = vld [vmem:[%s3115_s3 + $0x170] sm:$0xff]   ;;  %v2569_v63 = vld [vmem:[%s3115_s3 + $0x178] sm:$0xff]  }
  0x16   : > { %s1937_s25 = sshll.u32 %s348_s15, 2  ;;  %s3131_s8 = smov (!%p354_p7, %s351_s8), 17  ;;  %v2566_v62 = vld [vmem:[%s3115_s3 + $0x130] sm:$0xff]   ;;  %v2568_v0 = vld [vmem:[%s3115_s3 + $0x138] sm:$0xff]   ;;  %v2571_v2 = vld [vmem:[%s3115_s3 + $0x140] sm:$0xff]  }
  0x17   : > { %s350_s30 = scalar_lea.vmem %s3112_s0, %s1937_s25  ;;  %2247 = vmatpush3.bf16.msra.mxu0 %v2532_v7  ;;  %s2482_s25 = smul.u32 3, %s3131_s8  ;;  %v2570_v3 = vld [vmem:[%s3115_s3 + $0x100] sm:$0xff]   ;;  %v2573_v4 = vld [vmem:[%s3115_s3 + $0x148] sm:$0xff]   ;;  %v2575_v6 = vld [vmem:[%s3115_s3 + $0x150] sm:$0xff]  }
  0x18   : > { %v2751_v9 = vld [vmem:[%s350_s30] sm:$0xff]   ;;  %v2535_v10 = vld [vmem:[%s350_s30 + $0x8] ss:$0 sps:$4 sm:$0x11]   ;;  %2295 = vmatpush3.bf16.msra.mxu1 %v2533_v8  ;;  %2252 = vmatprep.subr.bf16.mxu0 %v2636_v1  ;;  %s369_s28 = sadd.s32 %s2483_s17, %s2732_s11  ;;  %v2574_v7 = vld [vmem:[%s3115_s3 + $0x110] sm:$0xff]  }
  0x19   : > { %v434_v11 = vshrl.u32 %v2751_v9, 16  ;;  %v436_v12 = vshll.u32 %v2751_v9, 16  ;;  %v794_v13 = vrot.slane %v2751_v9, 1  ;;  %v441_v15 = vshll.u32 %v2535_v10, 16  ;;  %2300 = vmatprep.subr.bf16.mxu1 %v2636_v1  ;;  %s358_s26 = sadd.s32 %s2482_s25, %s2732_s11  ;;  %s1939_s7 = sshll.u32 %s369_s28, 2  ;;  %v2572_v5 = vld [vmem:[%s3115_s3 + $0x108] sm:$0xff]  }
  0x1a   : > { %v795_v16 = vrot.slane %v2535_v10, 1  ;;  %s1938_s29 = sshll.u32 %s358_s26, 2  ;;  %s2893_s14 = scalar_lea.vmem %s3114_s2, %s1939_s7  ;;  %v2577_v8 = vld [vmem:[%s3115_s3 + $0x158] sm:$0xff]   ;;  %v2579_v10 = vld [vmem:[%s3115_s3 + $0x1c0] sm:$0xff]  }
  0x1b   : > { %v438_v17 = vrot.slane %v436_v12, 1  ;;  %v443_v18 = vrot.slane %v441_v15, 1  ;;  %s360_s8 = scalar_lea.vmem %s3113_s1, %s1938_s29  ;;  %v2578_v12 = vld [vmem:[%s3115_s3 + $0x180] sm:$0xff]   ;;  %s1940_s11 = sshll.u32 %s2618_s18, 1 }
  0x1c   : > { %v796_v20 = vsel %vm793_vm2, %v794_v13, %v795_v16  ;;  %v2803_v30 = vld [vmem:[%s360_s8] sm:$0xff]   ;;  %v2807_v31 = vld [vmem:[%s360_s8 + $0x8] ss:$0 sps:$4 sm:$0x11]   ;;  %p384_p9 = scmp.lt.s32.totalorder %s1940_s11, 31 }
  0x1d   : > { %v439_v21 = vor.u32 %v438_v17, %v434_v11  ;;  %2297 = vmatmul.mubr.msk.bf16.vlgmr.msra.gmra.mrb[0].mxu1 %vm469_vm1, %v796_v20  ;;  %v679_v34 = vshll.u32 %v2803_v30, 16  ;;  %v677_v37 = vshrl.u32 %v2803_v30, 16  ;;  %v684_v39 = vshll.u32 %v2807_v31, 16  ;;  %v2982_v11 = vld [vmem:[%s2893_s14] sm:$0xff]   ;;  %v2581_v13 = vld [vmem:[%s3115_s3 + $0x1c8] sm:$0xff]   ;;  %v2583_v17 = vld [vmem:[%s3115_s3 + $0x1d0] sm:$0xff]  }
  0x1e   : > { %2301 = vmatpush3.bf16.msra.mxu1 %v2537_v14  ;;  %2308 = vmatprep.mubr.msk.bf16.mxu1 %vm2637_vm0, %v2636_v1  ;;  %v1015_v52 = vrot.slane %v2803_v30, 1  ;;  %v1016_v54 = vrot.slane %v2807_v31, 1  ;;  %v2588_v14 = vld [vmem:[%s2893_s14 + $0x8] ss:$0 sps:$4 sm:$0x11]   ;;  %v1343_v15 = vshll.u32 %v2982_v11, 16 }
  0x1f   : > { %v444_v23 = vsel %vm432_vm3, %v439_v21, %v443_v18  ;;  %2302 = vmatprep.subr.bf16.mxu1 %v2636_v1  ;;  %v681_v38 = vrot.slane %v679_v34, 1  ;;  %v686_v43 = vrot.slane %v684_v39, 1  ;;  %v2580_v16 = vld [vmem:[%s3115_s3 + $0x188] sm:$0xff]   ;;  %v1341_v18 = vshrl.u32 %v2982_v11, 16  ;;  %v2582_v21 = vld [vmem:[%s3115_s3 + $0x190] sm:$0xff]   ;;  %s3135_s11 = smov (!%p384_p9, %s1940_s11), 31 }
  0x20   : > { %2249 = vmatmul.mubr.msk.bf16.vlgmr.msra.gmra.mrb[0].mxu0 %vm469_vm1, %v444_v23  ;;  %v1017_v56 = vsel %vm793_vm2, %v1015_v52, %v1016_v54  ;;  %v1348_v20 = vshll.u32 %v2588_v14, 16  ;;  %v2593_v31 = vld [vmem:[%s3115_s3 + $0x1f0] sm:$0xff]   ;;  %v1664_v34 = vrot.slane %v2982_v11, 1  ;;  %s1941_s10 = sshll.u32 %s3135_s11, 2 }
  0x21   : > { %2253 = vmatpush3.bf16.msra.mxu0 %v2536_v19  ;;  %2260 = vmatprep.mubr.msk.bf16.mxu0 %vm2637_vm0, %v2636_v1  ;;  %v682_v42 = vor.u32 %v681_v38, %v677_v37  ;;  %v1345_v19 = vrot.slane %v1343_v15, 1  ;;  %s391_s13 = sadd.s32 %s1942_s12, %s1941_s10  ;;  %v1992_v38 = vld [vmem:[%s3116_s4] ss:$0 sm:$0xff] }
  0x22   : > { %2254 = vmatprep.subr.bf16.mxu0 %v2636_v1  ;;  %2303 = vmatpush3.bf16.msra.mxu1 %v2539_v22  ;;  %v2585_v22 = vld [vmem:[%s3115_s3 + $0x1d8] sm:$0xff]   ;;  %s1943_s26 = sshll.u32 %s391_s13, 3 }
  0x23   : > { %2304 = vmatprep.subr.bf16.mxu1 %v2636_v1  ;;  %v2849_v45 = vsel %vm432_vm3, %v682_v42, %v686_v43  ;;  %s3079_s27 = scalar_lea.vmem %s3117_s5, %s1943_s26 }
  0x25   : > { %2255 = vmatpush3.bf16.msra.mxu0 %v2538_v24  ;;  %v1350_v24 = vrot.slane %v1348_v20, 1 }
  0x26   : > { %2256 = vmatprep.subr.bf16.mxu0 %v2636_v1  ;;  %2305 = vmatpush3.bf16.msra.mxu1 %v2541_v25  ;;  %v2584_v25 = vld [vmem:[%s3115_s3 + $0x198] sm:$0xff]  }
  0x27   : > { %2306 = vmatprep.subr.bf16.mxu1 %v2636_v1 }
  0x29   : > { %2257 = vmatpush3.bf16.msra.mxu0 %v2540_v26 }
  0x2a   : > { %2258 = vmatprep.subr.bf16.mxu0 %v2636_v1  ;;  %2307 = vmatpush3.bf16.msra.mxu1 %v2543_v27  ;;  %v2589_v27 = vld [vmem:[%s3115_s3 + $0x1e0] sm:$0xff]  }
  0x2b   : > { %2312 = vmatprep.subr.bf16.mxu1 %v2636_v1 }
  0x2d   : > { %2259 = vmatpush3.bf16.msra.mxu0 %v2542_v28  ;;  %2309 = vmatmul.mubr.msk.bf16.vlgmr.msra.gmra.mrb[0].mxu1 %vm469_vm1, %v444_v23  ;;  %v1346_v23 = vor.u32 %v1345_v19, %v1341_v18  ;;  %v2587_v28 = vld [vmem:[%s3115_s3 + $0x1a0] sm:$0xff]  }
  0x2e   : > { %2264 = vmatprep.subr.bf16.mxu0 %v2636_v1  ;;  %2313 = vmatpush3.bf16.msra.mxu1 %v2545_v29  ;;  %v2591_v29 = vld [vmem:[%s3115_s3 + $0x1e8] sm:$0xff]  }
  0x2f   : > { %2314 = vmatprep.subr.bf16.mxu1 %v2636_v1  ;;  %2320 = vmatprep.mubr.msk.bf16.mxu1 %vm2637_vm0, %v2636_v1  ;;  %v1351_v26 = vsel %vm432_vm3, %v1346_v23, %v1350_v24 }
  0x30   : > { %2261 = vmatmul.mubr.msk.bf16.vlgmr.msra.gmra.mrb[0].mxu0 %vm469_vm1, %v2751_v9  ;;  %v2576_v9 = vld [vmem:[%s3115_s3 + $0x118] sm:$0xff]  }
  0x31   : > { %2265 = vmatpush3.bf16.msra.mxu0 %v2544_v32  ;;  %2272 = vmatprep.mubr.msk.bf16.mxu0 %vm2637_vm0, %v2636_v1  ;;  %v2592_v32 = vld [vmem:[%s3115_s3 + $0x1b0] sm:$0xff]  }
  0x32   : > { %2266 = vmatprep.subr.bf16.mxu0 %v2636_v1  ;;  %2315 = vmatpush3.bf16.msra.mxu1 %v2547_v33  ;;  %v2595_v33 = vld [vmem:[%s3115_s3 + $0x1f8] sm:$0xff]  }
  0x33   : > { %2316 = vmatprep.subr.bf16.mxu1 %v2636_v1 }
  0x35   : > { %2267 = vmatpush3.bf16.msra.mxu0 %v2546_v35  ;;  %v1665_v35 = vrot.slane %v2588_v14, 1 }
  0x36   : > { %2268 = vmatprep.subr.bf16.mxu0 %v2636_v1  ;;  %2317 = vmatpush3.bf16.msra.mxu1 %v2549_v36  ;;  %v2594_v36 = vld [vmem:[%s3115_s3 + $0x1b8] sm:$0xff]  }
  0x37   : > { %2318 = vmatprep.subr.bf16.mxu1 %v2636_v1  ;;  %v1666_v37 = vsel %vm793_vm2, %v1664_v34, %v1665_v35 }
  0x39   : > { %2269 = vmatpush3.bf16.msra.mxu0 %v2548_v40 }
  0x3a   : > { %2270 = vmatprep.subr.bf16.mxu0 %v2636_v1  ;;  %2319 = vmatpush3.bf16.msra.mxu1 %v2551_v41 }
  0x3b   : > { %2324 = vmatprep.subr.bf16.mxu1 %v2636_v1 }
  0x3d   : > { %2271 = vmatpush3.bf16.msra.mxu0 %v2550_v44  ;;  %2321 = vmatmul.mubr.msk.bf16.vlgmr.msra.gmra.mrb[0].mxu1 %vm469_vm1, %v2849_v45 }
  0x3e   : > { %2276 = vmatprep.subr.bf16.mxu0 %v2636_v1  ;;  %2325 = vmatpush3.bf16.msra.mxu1 %v2555_v46 }
  0x3f   : > { %2326 = vmatprep.subr.bf16.mxu1 %v2636_v1  ;;  %2332 = vmatprep.mubr.msk.bf16.mxu1 %vm2637_vm0, %v2636_v1 }
  0x40   : > { %2273 = vmatmul.mubr.msk.bf16.vlgmr.msra.gmra.mrb[0].mxu0 %vm469_vm1, %v2803_v30 }
  0x41   : > { %2277 = vmatpush3.bf16.msra.mxu0 %v2553_v47  ;;  %2284 = vmatprep.mubr.msk.bf16.mxu0 %vm2637_vm0, %v2636_v1 }
  0x42   : > { %2278 = vmatprep.subr.bf16.mxu0 %v2636_v1  ;;  %2327 = vmatpush3.bf16.msra.mxu1 %v2557_v48 }
  0x43   : > { %2328 = vmatprep.subr.bf16.mxu1 %v2636_v1 }
  0x45   : > { %2279 = vmatpush3.bf16.msra.mxu0 %v2556_v49 }
  0x46   : > { %2280 = vmatprep.subr.bf16.mxu0 %v2636_v1  ;;  %2329 = vmatpush3.bf16.msra.mxu1 %v2559_v50 }
  0x47   : > { %2330 = vmatprep.subr.bf16.mxu1 %v2636_v1 }
  0x49   : > { %2281 = vmatpush3.bf16.msra.mxu0 %v2558_v51 }
  0x4a   : > { %2282 = vmatprep.subr.bf16.mxu0 %v2636_v1  ;;  %2331 = vmatpush3.bf16.msra.mxu1 %v2561_v53 }
  0x4b   : > { %2384 = vmatprep.subr.bf16.mxu1 %v2636_v1 }
  0x4d   : > { %2283 = vmatpush3.bf16.msra.mxu0 %v2560_v55  ;;  %2333 = vmatmul.mubr.msk.bf16.vlgmr.msra.gmra.mrb[0].mxu1 %vm469_vm1, %v1017_v56 }
  0x4e   : > { %2336 = vmatprep.subr.bf16.mxu0 %v2636_v1  ;;  %2385 = vmatpush3.bf16.msra.mxu1 %v2563_v57 }
  0x4f   : > { %2386 = vmatprep.subr.bf16.mxu1 %v2636_v1  ;;  %2392 = vmatprep.mubr.msk.bf16.mxu1 %vm2637_vm0, %v2636_v1 }
  0x50   : > { %2285 = vmatmul.mubr.msk.bf16.vlgmr.msra.gmra.mrb[0].mxu0 %vm469_vm1, %v2849_v45 }
  0x51   : > { %2337 = vmatpush3.bf16.msra.mxu0 %v2562_v58  ;;  %2344 = vmatprep.mubr.msk.bf16.mxu0 %vm2637_vm0, %v2636_v1 }
  0x52   : > { %2338 = vmatprep.subr.bf16.mxu0 %v2636_v1  ;;  %2387 = vmatpush3.bf16.msra.mxu1 %v2565_v59 }
  0x53   : > { %2388 = vmatprep.subr.bf16.mxu1 %v2636_v1 }
  0x55   : > { %2339 = vmatpush3.bf16.msra.mxu0 %v2564_v60 }
  0x56   : > { %2340 = vmatprep.subr.bf16.mxu0 %v2636_v1  ;;  %2389 = vmatpush3.bf16.msra.mxu1 %v2567_v61 }
  0x57   : > { %2390 = vmatprep.subr.bf16.mxu1 %v2636_v1 }
  0x59   : > { %2341 = vmatpush3.bf16.msra.mxu0 %v2566_v62 }
  0x5a   : > { %2342 = vmatprep.subr.bf16.mxu0 %v2636_v1  ;;  %2391 = vmatpush3.bf16.msra.mxu1 %v2569_v63 }
  0x5b   : > { %2396 = vmatprep.subr.bf16.mxu1 %v2636_v1 }
  0x5d   : > { %2343 = vmatpush3.bf16.msra.mxu0 %v2568_v0  ;;  %2393 = vmatmul.mubr.msk.bf16.vlgmr.msra.gmra.mrb[4].mxu1 %vm469_vm1, %v1017_v56 }
  0x5e   : > { %2348 = vmatprep.subr.bf16.mxu0 %v2636_v1  ;;  %2397 = vmatpush3.bf16.msra.mxu1 %v2571_v2 }
  0x5f   : > { %2398 = vmatprep.subr.bf16.mxu1 %v2636_v1  ;;  %2404 = vmatprep.mubr.msk.bf16.mxu1 %vm2637_vm0, %v2636_v1 }
  0x60   : > { %2345 = vmatmul.mubr.msk.bf16.vlgmr.msra.gmra.mrb[4].mxu0 %vm469_vm1, %v2849_v45 }
  0x61   : > { %2349 = vmatpush3.bf16.msra.mxu0 %v2570_v3  ;;  %2356 = vmatprep.mubr.msk.bf16.mxu0 %vm2637_vm0, %v2636_v1 }
  0x62   : > { %2350 = vmatprep.subr.bf16.mxu0 %v2636_v1  ;;  %2399 = vmatpush3.bf16.msra.mxu1 %v2573_v4 }
  0x63   : > { %2400 = vmatprep.subr.bf16.mxu1 %v2636_v1 }
  0x65   : > { %2351 = vmatpush3.bf16.msra.mxu0 %v2572_v5 }
  0x66   : > { %2352 = vmatprep.subr.bf16.mxu0 %v2636_v1  ;;  %2401 = vmatpush3.bf16.msra.mxu1 %v2575_v6 }
  0x67   : > { %2402 = vmatprep.subr.bf16.mxu1 %v2636_v1 }
  0x69   : > { %2353 = vmatpush3.bf16.msra.mxu0 %v2574_v7 }
  0x6a   : > { %2354 = vmatprep.subr.bf16.mxu0 %v2636_v1  ;;  %2403 = vmatpush3.bf16.msra.mxu1 %v2577_v8 }
  0x6b   : > { %2408 = vmatprep.subr.bf16.mxu1 %v2636_v1 }
  0x6d   : > { %2355 = vmatpush3.bf16.msra.mxu0 %v2576_v9  ;;  %2405 = vmatmul.mubr.msk.bf16.vlgmr.msra.gmra.mrb[4].mxu1 %vm469_vm1, %v2849_v45 }
  0x6e   : > { %2360 = vmatprep.subr.bf16.mxu0 %v2636_v1  ;;  %2409 = vmatpush3.bf16.msra.mxu1 %v2579_v10 }
  0x6f   : > { %2410 = vmatprep.subr.bf16.mxu1 %v2636_v1  ;;  %2416 = vmatprep.mubr.msk.bf16.mxu1 %vm2637_vm0, %v2636_v1 }
  0x70   : > { %2357 = vmatmul.mubr.msk.bf16.vlgmr.msra.gmra.mrb[4].mxu0 %vm469_vm1, %v2803_v30  ;;  %v2590_v30 = vld [vmem:[%s3115_s3 + $0x1a8] sm:$0xff]  }
  0x71   : > { %2361 = vmatpush3.bf16.msra.mxu0 %v2578_v12  ;;  %2368 = vmatprep.mubr.msk.bf16.mxu0 %vm2637_vm0, %v2636_v1 }
  0x72   : > { %2362 = vmatprep.subr.bf16.mxu0 %v2636_v1  ;;  %2411 = vmatpush3.bf16.msra.mxu1 %v2581_v13 }
  0x73   : > { %2412 = vmatprep.subr.bf16.mxu1 %v2636_v1 }
  0x75   : > { %2363 = vmatpush3.bf16.msra.mxu0 %v2580_v16 }
  0x76   : > { %2364 = vmatprep.subr.bf16.mxu0 %v2636_v1  ;;  %2413 = vmatpush3.bf16.msra.mxu1 %v2583_v17 }
  0x77   : > { %2414 = vmatprep.subr.bf16.mxu1 %v2636_v1 }
  0x79   : > { %2365 = vmatpush3.bf16.msra.mxu0 %v2582_v21 }
  0x7a   : > { %2366 = vmatprep.subr.bf16.mxu0 %v2636_v1  ;;  %2415 = vmatpush3.bf16.msra.mxu1 %v2585_v22 }
  0x7b   : > { %2420 = vmatprep.subr.bf16.mxu1 %v2636_v1 }
  0x7d   : > { %2367 = vmatpush3.bf16.msra.mxu0 %v2584_v25  ;;  %2417 = vmatmul.mubr.msk.bf16.vlgmr.msra.gmra.mrb[4].mxu1 %vm469_vm1, %v1351_v26 }
  0x7e   : > { %2372 = vmatprep.subr.bf16.mxu0 %v2636_v1  ;;  %2421 = vmatpush3.bf16.msra.mxu1 %v2589_v27 }
  0x7f   : > { %2422 = vmatprep.subr.bf16.mxu1 %v2636_v1  ;;  %2428 = vmatprep.mubr.msk.bf16.mxu1 %vm2637_vm0, %v2636_v1 }
  0x80   : > { %2369 = vmatmul.mubr.msk.bf16.vlgmr.msra.gmra.mrb[4].mxu0 %vm469_vm1, %v2982_v11 }
  0x81   : > { %2373 = vmatpush3.bf16.msra.mxu0 %v2587_v28  ;;  %2380 = vmatprep.mubr.msk.bf16.mxu0 %vm2637_vm0, %v2636_v1 }
  0x82   : > { %2374 = vmatprep.subr.bf16.mxu0 %v2636_v1  ;;  %2423 = vmatpush3.bf16.msra.mxu1 %v2591_v29 }
  0x83   : > { %2424 = vmatprep.subr.bf16.mxu1 %v2636_v1 }
  0x85   : > { %2375 = vmatpush3.bf16.msra.mxu0 %v2590_v30 }
  0x86   : > { %2376 = vmatprep.subr.bf16.mxu0 %v2636_v1  ;;  %2425 = vmatpush3.bf16.msra.mxu1 %v2593_v31 }
  0x87   : > { %2426 = vmatprep.subr.bf16.mxu1 %v2636_v1 }
  0x89   : > { %2377 = vmatpush3.bf16.msra.mxu0 %v2592_v32 }
  0x8a   : > { %2378 = vmatprep.subr.bf16.mxu0 %v2636_v1  ;;  %2427 = vmatpush3.bf16.msra.mxu1 %v2595_v33  ;;  %v1993_v1 = vld [vmem:[%s3116_s4 + $0x1] ss:$0 sm:$0xff] }
  0x8d   : > { %2379 = vmatpush3.bf16.msra.mxu0 %v2594_v36  ;;  %2429 = vmatmul.mubr.msk.bf16.vlgmr.msra.gmra.mrb[4].mxu1 %vm469_vm1, %v1666_v37 }
  0x90   : > { %2381 = vmatmul.mubr.msk.bf16.vlgmr.msra.gmra.mrb[4].mxu0 %vm469_vm1, %v1351_v26 }
 0x120   : > { %v1079_v39 = vpop.f32.mrb[0].mxu1 }
 0x121   : > { %v1088_v40 = vmul.f32 %v1992_v38, %v1079_v39  ;;  %v2334_v41 = vpop.f32.mrb[1].mxu1 }
 0x122   : > { %v1082_v42 = vpop.f32.mrb[2].mxu1 }
 0x123   : > { %v749_v43 = vpop.f32.mrb[0].mxu0  ;;  %v1090_v44 = vadd.f32 %v1993_v1, %v1088_v40  ;;  %v1089_v45 = vmul.f32 %v1992_v38, %v1082_v42  ;;  %v2335_v46 = vpop.f32.mrb[3].mxu1 }
 0x124   : > { %v762_v47 = vmul.f32 %v1992_v38, %v749_v43  ;;  %v2286_v48 = vpop.f32.mrb[1].mxu0 }
 0x125   : > { %v1092_v49 = vmax.f32 %v1090_v44, 0.0  ;;  %v752_v50 = vpop.f32.mrb[2].mxu0  ;;  %v1091_v51 = vadd.f32 %v1993_v1, %v1089_v45 }
 0x126   : > { %v768_v52 = vadd.f32 %v1993_v1, %v762_v47  ;;  %v763_v53 = vmul.f32 %v1992_v38, %v752_v50  ;;  %v2287_v54 = vpop.f32.mrb[3].mxu0 }
 0x127   : > { %2046 = vst.msk [vmem:[%s3079_s27 + $0x10] sm:$0xff] %vm772_vm4, %v1092_v49  ;;  %v1093_v55 = vmax.f32 %v1091_v51, 0.0 }
 0x128   : > { %v770_v56 = vmax.f32 %v768_v52, 0.0  ;;  %v769_v57 = vadd.f32 %v1993_v1, %v763_v53 }
 0x129   : > { %2047 = vst.msk [vmem:[%s3079_s27 + $0x18] sm:$0xff] %vm772_vm4, %v1093_v55 }
 0x12a   : > { %773 = vst.msk [vmem:[%s3079_s27] sm:$0xff] %vm772_vm4, %v770_v56  ;;  %v771_v58 = vmax.f32 %v769_v57, 0.0 }
 0x12c   : > { %774 = vst.msk [vmem:[%s3079_s27 + $0x8] sm:$0xff] %vm772_vm4, %v771_v58 }
 0x160   : > { %v1728_v59 = vpop.f32.mrb[4].mxu1 }
 0x161   : > { %v1737_v60 = vmul.f32 %v1992_v38, %v1728_v59  ;;  %v2430_v61 = vpop.f32.mrb[5].mxu1 }
 0x162   : > { %v1731_v62 = vpop.f32.mrb[6].mxu1 }
 0x163   : > { %v1413_v63 = vpop.f32.mrb[4].mxu0  ;;  %v1739_v0 = vadd.f32 %v1993_v1, %v1737_v60  ;;  %v1738_v2 = vmul.f32 %v1992_v38, %v1731_v62  ;;  %v2431_v3 = vpop.f32.mrb[7].mxu1 }
 0x164   : > { %v1422_v4 = vmul.f32 %v1992_v38, %v1413_v63  ;;  %v2382_v5 = vpop.f32.mrb[5].mxu0 }
 0x165   : > { %v1741_v6 = vmax.f32 %v1739_v0, 0.0  ;;  %v1416_v7 = vpop.f32.mrb[6].mxu0  ;;  %v1740_v8 = vadd.f32 %v1993_v1, %v1738_v2 }
 0x166   : > { %v1424_v9 = vadd.f32 %v1993_v1, %v1422_v4  ;;  %v1423_v10 = vmul.f32 %v1992_v38, %v1416_v7  ;;  %v2383_v11 = vpop.f32.mrb[7].mxu0 }
 0x167   : > { %2156 = vst.msk [vmem:[%s3079_s27 + $0x30] sm:$0xff] %vm772_vm4, %v1741_v6  ;;  %v1742_v12 = vmax.f32 %v1740_v8, 0.0 }
 0x168   : > { %v1426_v13 = vmax.f32 %v1424_v9, 0.0  ;;  %v1425_v14 = vadd.f32 %v1993_v1, %v1423_v10 }
 0x169   : > { %2157 = vst.msk [vmem:[%s3079_s27 + $0x38] sm:$0xff] %vm772_vm4, %v1742_v12 }
 0x16a   : > { %2102 = vst.msk [vmem:[%s3079_s27 + $0x20] sm:$0xff] %vm772_vm4, %v1426_v13  ;;  %v1427_v15 = vmax.f32 %v1425_v14, 0.0 }
 0x16c   : > { %2103 = vst.msk [vmem:[%s3079_s27 + $0x28] sm:$0xff] %vm772_vm4, %v1427_v15 }
 0x16d PF: > { %s15_s22 = sadd.s32 1, %s2634_s22   ;;  %s3118_s18 = smov %s2626_s20 }
 0x16e   : > { %p12_p10 = scmp.ge.s32.totalorder %s15_s22, 34   ;;  %s3119_s19 = smov %s2630_s21 }
 0x16f   : > { %s3120_s20 = smov %s3123_s23  ;;  %s3121_s21 = smov %s3127_s24 }
 0x170   :  { %14 = sbr.rel (!%p12_p10) target bundleno = 3 (0x3), region = 100 }

</bundles_post_ra>
